<compile_context>
chip_gen: v7x
topology: tpu7x:2x2x1
jax: 0.10.0
libtpu: 0.0.40
codegen_flags: <defaults>
</compile_context>

<pallas_src>
import functools

import jax
import jax.numpy as jnp
from jax.experimental import pallas as pl
from jax.experimental.pallas import tpu as pltpu

_INV_SQRT2 = 0.7071067811865476  # 1/sqrt(2): exact erf GELU (torch F.gelu default)
_MIB = 1024 * 1024


def _round_up(x, m):
    return ((x + m - 1) // m) * m


@functools.lru_cache(maxsize=1)
def _vmem_budget_bytes():
    """Per-generation safe VMEM budget for this kernel."""
    try:
        cap = int(pltpu.get_tpu_info().vmem_capacity_bytes)
    except Exception:  # pragma: no cover - conservative fallback
        cap = 128 * _MIB
    if cap >= 96 * _MIB:          # v5e / v6e: 128 MiB physical VMEM
        return 100 * _MIB
    # v7x: 64 MiB physical -> leave headroom for compiler scratch / semaphores.
    return max(cap - 14 * _MIB, 24 * _MIB)


def _gelu_erf(h):
    return 0.5 * h * (1.0 + jax.lax.erf(h * _INV_SQRT2))


# ---------------------------------------------------------------------------
# Kernels
# ---------------------------------------------------------------------------
def _ffn_resident_kernel(x_ref, wi_ref, wo_ref, o_ref):
    # x_ref: (tm, d_model); wi_ref: (d_model, d_ff) resident; wo_ref: (d_ff, d_model) resident.
    h = jnp.dot(x_ref[...], wi_ref[...], preferred_element_type=jnp.float32)
    h = _gelu_erf(h)
    # TODO(synk): dropout is a no-op at inference; training-mode dropout not implemented.
    o_ref[...] = jnp.dot(h.astype(wo_ref.dtype), wo_ref[...],
                         preferred_element_type=jnp.float32).astype(o_ref.dtype)


def _ffn_streaming_kernel(x_ref, wi_ref, wo_ref, o_ref, acc_ref):
    # x_ref: (tm, d_model); wi_ref: (d_model, tk); wo_ref: (tk, d_model);
    # o_ref: (tm, d_model); acc_ref: (tm, d_model) f32.
    k = pl.program_id(1)

    @pl.when(k == 0)
    def _():
        acc_ref[...] = jnp.zeros_like(acc_ref)

    h = jnp.dot(x_ref[...], wi_ref[...], preferred_element_type=jnp.float32)
    h = _gelu_erf(h)
    # TODO(synk): dropout is a no-op at inference; training-mode dropout not implemented.
    acc_ref[...] += jnp.dot(h.astype(wo_ref.dtype), wo_ref[...],
                            preferred_element_type=jnp.float32)

    @pl.when(k == pl.num_programs(1) - 1)
    def _():
        o_ref[...] = acc_ref[...].astype(o_ref.dtype)


# ---------------------------------------------------------------------------
# Tile selection helpers (all trace-time Python on static shapes)
# ---------------------------------------------------------------------------
def _select_resident_tm(M, d_model, d_ff, x_it, w_it, o_it, sub_min, budget,
                        tm_hint=None):
    """Largest M-tile such that both weights + per-tile working set fit VMEM."""
    weight_bytes = 2 * d_model * d_ff * w_it
    slack = 2 * _MIB

    def fits(tm_):
        return (weight_bytes
                + 2 * tm_ * d_model * x_it     # double-buffered x tiles
                + 2 * tm_ * d_model * o_it     # double-buffered out tiles
                + tm_ * d_ff * 4               # f32 hidden intermediate
                + tm_ * d_model * 4            # f32 second-dot result
                + slack) <= budget

    tm_cap = _round_up(M, sub_min)
    tm_eff = min(tm_hint if tm_hint is not None else 512, tm_cap)
    if tm_hint is None and M > sub_min:
        # Guarantee >=2 M tiles so both v7x TensorCores get work (free here:
        # weights are read from HBM once regardless of the M tiling).
        tm_eff = min(tm_eff, _round_up(pl.cdiv(M, 2), sub_min))
    tm_eff = max(_round_up(max(tm_eff, 1), sub_min), sub_min)
    while tm_eff > sub_min and not fits(tm_eff):
        tm_eff = max(sub_min, _round_up(tm_eff // 2, sub_min))
    return tm_eff if fits(tm_eff) else None


def _pick_tk(d_ff, target):
    """Largest multiple of 128 that divides d_ff and is <= target (or None)."""
    best = None
    t = 128
    limit = min(d_ff, target)
    while t <= limit:
        if d_ff % t == 0:
            best = t
        t += 128
    return best


# ---------------------------------------------------------------------------
# Wrapper
# ---------------------------------------------------------------------------
@functools.partial(jax.jit, static_argnames=("tm", "tk"))
def llmpu_dense_act_dense(x, wi_w, wo_w, *, tm=None, tk=None):
    """x: [B, S, d_model]; wi_w: [d_model, d_ff]; wo_w: [d_ff, d_model]."""
    B, S, d_model = x.shape
    d_ff = wi_w.shape[1]
    M = B * S
    x2d = x.reshape(M, d_model)

    out_dtype = wo_w.dtype  # module casts the hidden to wo.weight.dtype before wo
    x_it = jnp.dtype(x.dtype).itemsize
    w_it = jnp.dtype(wi_w.dtype).itemsize
    o_it = jnp.dtype(out_dtype).itemsize
    # Min sublane tile: 8 for 4-byte, 16 for 2-byte, 32 for 1-byte dtypes.
    sub_min = max(8, 32 // min(x_it, o_it))

    budget = _vmem_budget_bytes()
    slack = 2 * _MIB
    weight_bytes = 2 * d_model * d_ff * w_it
    flops = 4 * M * d_model * d_ff            # two matmuls
    trans = M * d_ff                          # erf

    # ------------------ fast path: weights fully resident in VMEM ------------------
    tm_res = None
    if tk is None:
        tm_res = _select_resident_tm(M, d_model, d_ff, x_it, w_it, o_it,
                                     sub_min, budget, tm_hint=tm)
    if tm_res is not None:
        grid_m = pl.cdiv(M, tm_res)
        vmem_need = (weight_bytes
                     + 2 * tm_res * d_model * (x_it + o_it)
                     + tm_res * d_ff * 4
                     + tm_res * d_model * 4
                     + slack)
        cost = pl.CostEstimate(
            flops=flops, transcendentals=trans,
            bytes_accessed=M * d_model * (x_it + o_it) + weight_bytes)

        out2d = pl.pallas_call(
            _ffn_resident_kernel,
            out_shape=jax.ShapeDtypeStruct((M, d_model), out_dtype),
            grid_spec=pltpu.PrefetchScalarGridSpec(
                num_scalar_prefetch=0,
                grid=(grid_m,),
                in_specs=[
                    pl.BlockSpec((tm_res, d_model), lambda i: (i, 0)),
                    pl.BlockSpec((d_model, d_ff), lambda i: (0, 0)),   # resident
                    pl.BlockSpec((d_ff, d_model), lambda i: (0, 0)),   # resident
                ],
                out_specs=pl.BlockSpec((tm_res, d_model), lambda i: (i, 0)),
            ),
            compiler_params=pltpu.CompilerParams(
                dimension_semantics=("parallel",),
                vmem_limit_bytes=int(min(max(vmem_need, 32 * _MIB), budget)),
            ),
            cost_estimate=cost,
        )(x2d, wi_w, wo_w)
        return out2d.reshape(B, S, d_model)

    # ------------------ streaming path: tile the d_ff reduction ------------------
    tk_target = tk if tk is not None else (512 if budget >= 96 * _MIB else 256)
    tk_eff = _pick_tk(d_ff, tk_target)
    dff_total = d_ff
    if tk_eff is None:
        # TODO(synk): d_ff not a multiple of 128 -- pad weights here (gelu(0)==0 so
        # exact); callers should pre-pad once outside the hot path to avoid this copy.
        tk_eff = min(_round_up(max(tk_target, 128), 128), _round_up(d_ff, 128))
        dff_total = _round_up(d_ff, tk_eff)
        wi_w = jnp.pad(wi_w, ((0, 0), (0, dff_total - d_ff)))
        wo_w = jnp.pad(wo_w, ((0, dff_total - d_ff), (0, 0)))

    # Generation-aware tm: streaming intensity is ~2*tm/w_itemsize flop/byte.
    tm_target = tm if tm is not None else (1024 if budget >= 96 * _MIB else 512)
    tm_eff = min(_round_up(max(tm_target, 1), sub_min), _round_up(M, sub_min))
    if tm is None and M >= 1024:
        # Keep >=2 M tiles (v7x megacore) when it does not hurt intensity much.
        tm_eff = min(tm_eff, max(512, _round_up(pl.cdiv(M, 2), sub_min)))

    def _stream_fit(tm_):
        return (2 * tm_ * d_model * x_it          # x tiles (double-buffered)
                + 2 * tm_ * d_model * o_it        # out tiles
                + 2 * d_model * tk_eff * w_it     # wi tiles
                + 2 * tk_eff * d_model * w_it     # wo tiles
                + tm_ * d_model * 4               # f32 accumulator
                + tm_ * tk_eff * 4                # f32 hidden tile
                + slack) <= budget

    while tm_eff > sub_min and not _stream_fit(tm_eff):
        tm_eff = max(sub_min, _round_up(tm_eff // 2, sub_min))

    grid = (pl.cdiv(M, tm_eff), dff_total // tk_eff)
    vmem_need = (2 * tm_eff * d_model * (x_it + o_it)
                 + 4 * d_model * tk_eff * w_it
                 + tm_eff * d_model * 4
                 + tm_eff * tk_eff * 4
                 + slack)
    cost = pl.CostEstimate(
        flops=flops, transcendentals=trans,
        bytes_accessed=(M * d_model * (x_it + o_it)
                        + grid[0] * 2 * d_model * dff_total * w_it))

    out2d = pl.pallas_call(
        _ffn_streaming_kernel,
        out_shape=jax.ShapeDtypeStruct((M, d_model), out_dtype),
        grid_spec=pltpu.PrefetchScalarGridSpec(
            num_scalar_prefetch=0,
            grid=grid,
            in_specs=[
                pl.BlockSpec((tm_eff, d_model), lambda i, k: (i, 0)),
                pl.BlockSpec((d_model, tk_eff), lambda i, k: (0, k)),
                pl.BlockSpec((tk_eff, d_model), lambda i, k: (k, 0)),
            ],
            out_specs=pl.BlockSpec((tm_eff, d_model), lambda i, k: (i, 0)),
            scratch_shapes=[pltpu.VMEM((tm_eff, d_model), jnp.float32)],
        ),
        compiler_params=pltpu.CompilerParams(
            dimension_semantics=("parallel", "arbitrary"),
            vmem_limit_bytes=int(min(max(vmem_need, 32 * _MIB), budget)),
        ),
        cost_estimate=cost,
    )(x2d, wi_w, wo_w)
    return out2d.reshape(B, S, d_model)


def _reference(x, wi_w, wo_w):
    h = x.astype(jnp.float32) @ wi_w.astype(jnp.float32)
    h = 0.5 * h * (1.0 + jax.lax.erf(h / jnp.sqrt(2.0)))
    return (h.astype(wo_w.dtype).astype(jnp.float32)
            @ wo_w.astype(jnp.float32)).astype(wo_w.dtype)


if __name__ == "__main__":
    # Small config consistent with the module: d_model=32, d_ff=128.
    B, S, d_model, d_ff = 2, 8, 32, 128

    key = jax.random.PRNGKey(0)
    kx, kwi, kwo = jax.random.split(key, 3)

    # nn.Linear weights are [out, in]; we store [in, out].
    x = jax.random.normal(kx, (B, S, d_model), dtype=jnp.float32)
    wi_w = (jax.random.normal(kwi, (d_ff, d_model), dtype=jnp.float32) * 0.05).T  # [d_model, d_ff]
    wo_w = (jax.random.normal(kwo, (d_model, d_ff), dtype=jnp.float32) * 0.05).T  # [d_ff, d_model]

    y = llmpu_dense_act_dense(x, wi_w, wo_w)          # weights-resident fast path
    y = jax.block_until_ready(y)

    y_ref = _reference(x, wi_w, wo_w)
    assert y.shape == (B, S, d_model)
    assert jnp.allclose(y, y_ref, atol=1e-4, rtol=1e-4), "mismatch vs reference (resident)"

    # Exercise the streaming (d_ff-reduction) path with a non-divisible M:
    # explicit tk forces the accumulator path, partial last M block checks
    # the no-pad cdiv grid / dropped-OOB-store behavior.
    B2, S2, dm2, dff2 = 3, 7, 128, 1024
    k2x, k2i, k2o = jax.random.split(jax.random.PRNGKey(1), 3)
    x2 = jax.random.normal(k2x, (B2, S2, dm2), dtype=jnp.float32)
    wi2 = jax.random.normal(k2i, (dm2, dff2), dtype=jnp.float32) * 0.02
    wo2 = jax.random.normal(k2o, (dff2, dm2), dtype=jnp.float32) * 0.02
    y2 = jax.block_until_ready(llmpu_dense_act_dense(x2, wi2, wo2, tm=128, tk=256))
    y2_ref = _reference(x2, wi2, wo2)
    assert y2.shape == (B2, S2, dm2)
    assert jnp.allclose(y2, y2_ref, atol=1e-3, rtol=1e-3), "mismatch vs reference (streaming)"

    print("KERNEL_OK")
</pallas_src>

<mosaic_0001>
module attributes {stable_mosaic.version = 11 : i64} {
  func.func @_ffn_resident_kernel(%arg0: i32, %arg1: memref<8x32xf32, #tpu.memory_space<vmem>>, %arg2: memref<32x128xf32, #tpu.memory_space<vmem>>, %arg3: memref<128x32xf32, #tpu.memory_space<vmem>>, %arg4: memref<8x32xf32, #tpu.memory_space<vmem>>) attributes {dimension_semantics = [#tpu.dimension_semantics<parallel>], iteration_bounds = array<i64: 2>, scalar_prefetch = 0 : i64, scratch_operands = 0 : i64, tpu.core_type = #tpu.core_type<tc>, window_params = [{transform_indices = @transform_0, window_bounds = array<i64: 8, 32>}, {pipeline_mode = #tpu.pipeline_mode<synchronous>, transform_indices = @transform_1, window_bounds = array<i64: 32, 128>}, {pipeline_mode = #tpu.pipeline_mode<synchronous>, transform_indices = @transform_2, window_bounds = array<i64: 128, 32>}, {transform_indices = @transform_3, window_bounds = array<i64: 8, 32>}]} {
    %c0 = arith.constant 0 : index
    %c0_0 = arith.constant 0 : index
    %0 = vector.load %arg1[%c0, %c0_0] : memref<8x32xf32, #tpu.memory_space<vmem>>, vector<8x32xf32>
    %c0_1 = arith.constant 0 : index
    %c0_2 = arith.constant 0 : index
    %1 = vector.load %arg2[%c0_1, %c0_2] : memref<32x128xf32, #tpu.memory_space<vmem>>, vector<32x128xf32>
    %cst = arith.constant dense<0.000000e+00> : vector<8x128xf32>
    %2 = tpu.matmul %0, %1, %cst {dimension_numbers = #tpu.dot_dimension_numbers<[1], [0], [0], [1], [0, 0, 1, 1], [], []>} : vector<8x32xf32>, vector<32x128xf32>, vector<8x128xf32> -> vector<8x128xf32>
    %cst_3 = arith.constant 5.000000e-01 : f32
    %3 = vector.broadcast %cst_3 : f32 to vector<8x128xf32>
    %4 = arith.mulf %3, %2 : vector<8x128xf32>
    %cst_4 = arith.constant 0.707106769 : f32
    %5 = vector.broadcast %cst_4 : f32 to vector<8x128xf32>
    %6 = arith.mulf %2, %5 : vector<8x128xf32>
    %7 = math.erf %6 : vector<8x128xf32>
    %cst_5 = arith.constant 1.000000e+00 : f32
    %8 = vector.broadcast %cst_5 : f32 to vector<8x128xf32>
    %9 = arith.addf %8, %7 : vector<8x128xf32>
    %10 = arith.mulf %4, %9 : vector<8x128xf32>
    %c0_6 = arith.constant 0 : index
    %c0_7 = arith.constant 0 : index
    %11 = vector.load %arg3[%c0_6, %c0_7] : memref<128x32xf32, #tpu.memory_space<vmem>>, vector<128x32xf32>
    %cst_8 = arith.constant dense<0.000000e+00> : vector<8x32xf32>
    %12 = tpu.matmul %10, %11, %cst_8 {dimension_numbers = #tpu.dot_dimension_numbers<[1], [0], [0], [1], [0, 0, 1, 1], [], []>} : vector<8x128xf32>, vector<128x32xf32>, vector<8x32xf32> -> vector<8x32xf32>
    %c0_9 = arith.constant 0 : index
    %c0_10 = arith.constant 0 : index
    %13 = vector.load %arg4[%c0_9, %c0_10] : memref<8x32xf32, #tpu.memory_space<vmem>>, vector<8x32xf32>
    tpu.vector_store %arg4[%c0_9, %c0_10], %12 {strides = array<i32>} : memref<8x32xf32, #tpu.memory_space<vmem>>, vector<8x32xf32>,
    return
  }
  func.func @transform_0(%arg0: i32) -> (i32, i32) {
    %c0_i32 = arith.constant 0 : i32
    %c0_i32_0 = arith.constant 0 : i32
    return %arg0, %c0_i32 : i32, i32
  }
  func.func @transform_1(%arg0: i32) -> (i32, i32) {
    %c0_i32 = arith.constant 0 : i32
    %c0_i32_0 = arith.constant 0 : i32
    %c0_i32_1 = arith.constant 0 : i32
    return %c0_i32, %c0_i32_0 : i32, i32
  }
  func.func @transform_2(%arg0: i32) -> (i32, i32) {
    %c0_i32 = arith.constant 0 : i32
    %c0_i32_0 = arith.constant 0 : i32
    %c0_i32_1 = arith.constant 0 : i32
    return %c0_i32, %c0_i32_0 : i32, i32
  }
  func.func @transform_3(%arg0: i32) -> (i32, i32) {
    %c0_i32 = arith.constant 0 : i32
    %c0_i32_0 = arith.constant 0 : i32
    return %arg0, %c0_i32 : i32, i32
  }
}

</mosaic_0001>

<bundles_post_ra>
// kernel: llmpu_dense_act_dense.1
= control target key start
LH: loop header
LB: loop body
LE: loop exit
PB: predicated region body
PF: predicated region fallthrough
CT: control target
= control target key end

     0   :  { %8 = vsyncpa [#allocation3], 0  ;;  %s813_s0 = inlined_call_operand.vmem [shape: f32[16,32], index: 0, kind: input, shape index: {}]   ;;  %s814_s1 = inlined_call_operand.vmem [shape: f32[32,128], index: 1, kind: input, shape index: {}]   ;;  %s815_s2 = inlined_call_operand.vmem [shape: f32[128,32], index: 2, kind: input, shape index: {}]   ;;  %s816_s3 = inlined_call_operand.hbm [shape: f32[16,32], index: 3, kind: output, shape index: {}]  }
   0x1   :  { %10 = vsyncpa [#allocation3 + $0x1], 0  ;;  %s651_s12 = smov 0   ;;  %s653_s13 = smov 0  }
   0x2   :  { %s655_s14 = smov 0   ;;  %s657_s15 = smov 0  }
   0x3 LB: > { %s672_s16 = sadd.s32 4294967295, %s625_s15   ;;  %s410_s17 = sadd.s32 4294967294, %s625_s15   ;;  %s625_s15 = sphi %s657_s15, %s822_s15   ;;  %s621_s14 = sphi %s655_s14, %s821_s14   ;;  %s617_s13 = sphi %s653_s13, %s820_s13   ;;  %s613_s12 = sphi %s651_s12, %s819_s12  }
   0x4   : > { %s676_s18 = sadd.s32 1, %s625_s15   ;;  %s91_s19 = sadd.s32 1, %s621_s14 }
   0x5   : > { %s88_s20 = ssub.s32 %s625_s15, %s676_s18  ;;  %p101_p0 = scmp.ne.s32.totalorder %s621_s14, %s617_s13 }
   0x6   : > { %p89_p1 = scmp.eq.s32.totalorder %s88_s20, 0  ;;  %p102_p2 = scmp.eq.s32.totalorder %s672_s16, 1 }
   0x7   : > { %p107_p3 = scmp.ne.s32.totalorder %s617_s13, %s613_s12  ;;  %p108_p4 = scmp.eq.s32.totalorder %s410_s17, 1 }
   0x8   : > { %s687_s21 = scalar_select %p89_p1, %s621_s14, %s91_s19  }
   0x9   : > { %p689_p5 = por %p102_p2, %p101_p0  ;;  %p693_p6 = por %p108_p4, %p107_p3 }
   0xa   : > { %p413_p7 = scmp.ge.s32.totalorder %s625_s15, 1  ;;  %p139_p8 = scmp.lt.s32.totalorder %s625_s15, 3 }
   0xc   : > { %p140_p9 = pnand %p413_p7, %p139_p8 }
   0xd   : > { %v167_v0 = vld [vmem:[%s814_s1] sm:$0xff] (!%p140_p9)  ;;  %v168_v1 = vld [vmem:[%s814_s1 + $0x8] sm:$0xff] (!%p140_p9)  ;;  %v169_v2 = vld [vmem:[%s814_s1 + $0x10] sm:$0xff] (!%p140_p9)  ;;  %v627_v3 = vmov (!%p140_p9), 0.0|0.0   ;;  %vm628_vm0 = vmmov (!%p140_p9), 0   ;;  %v629_v6 = vmov (!%p140_p9), 0.0  }
   0xe   : > { %143 = sbr.rel (%p140_p9) target bundleno = 481 (0x1e1), region = 32  ;;  %489 = vmatprep.subr.bf16.mxu0 (!%p140_p9), %v627_v3  ;;  %v490_v4 = vpack.c.bf16 (!%p140_p9), %v168_v1, %v167_v0  ;;  %v170_v5 = vld [vmem:[%s814_s1 + $0x18] sm:$0xff] (!%p140_p9)  ;;  %451 = vmatprep.mubr.msk.f32.mxu0 (!%p140_p9), %vm628_vm0, %v629_v6  ;;  %p162_p10 = scmp.lt.s32.totalorder (!%p140_p9), %s672_s16, 1  ;;  %v250_v7 = vld [vmem:[%s815_s2] sm:$0xff] (!%p140_p9)  ;;  %v251_v8 = vld [vmem:[%s815_s2 + $0x8] sm:$0xff] (!%p140_p9)  ;;  %vm171_vm1 = vcmask (!%p140_p9), 261120  }
   0xf   : > { %495 = vmatprep.subr.bf16.mxu1 (!%p140_p9), %v627_v3  ;;  %v496_v9 = vpack.c.bf16 (!%p140_p9), %v251_v8, %v250_v7  ;;  %v252_v10 = vld [vmem:[%s815_s2 + $0x10] sm:$0xff] (!%p140_p9)  ;;  %v253_v11 = vld [vmem:[%s815_s2 + $0x18] sm:$0xff] (!%p140_p9)  ;;  %486 = vmatprep.mubr.msk.f32.mxu1 (!%p140_p9), %vm628_vm0, %v629_v6  ;;  %v493_v12 = vpack.c.bf16 (!%p140_p9), %v170_v5, %v169_v2  ;;  %v254_v14 = vld [vmem:[%s815_s2 + $0x20] sm:$0xff] (!%p140_p9)  ;;  %s159_s6 = sand.u32 (!%p140_p9), 1, %s617_s13   ;;  %s418_s8 = sshll.u32 (!%p140_p9), %s672_s16, 7 }
  0x10   : > { %491 = vmatpush3.bf16.msra.mxu0 (!%p140_p9), %v490_v4  ;;  %v499_v13 = vpack.c.bf16 (!%p140_p9), %v253_v11, %v252_v10  ;;  %v255_v15 = vld [vmem:[%s815_s2 + $0x28] sm:$0xff] (!%p140_p9)  ;;  %v256_v18 = vld [vmem:[%s815_s2 + $0x30] sm:$0xff] (!%p140_p9)  ;;  %v257_v19 = vld [vmem:[%s815_s2 + $0x38] sm:$0xff] (!%p140_p9)  ;;  %s414_s7 = sshll.u32 (!%p140_p9), %s159_s6, 3 }
  0x11   : > { %492 = vmatprep.subr.bf16.mxu0 (!%p140_p9), %v627_v3  ;;  %497 = vmatpush3.bf16.msra.mxu1 (!%p140_p9), %v496_v9  ;;  %v502_v17 = vpack.c.bf16 (!%p140_p9), %v255_v15, %v254_v14  ;;  %v505_v20 = vpack.c.bf16 (!%p140_p9), %v257_v19, %v256_v18  ;;  %v258_v21 = vld [vmem:[%s815_s2 + $0x40] sm:$0xff] (!%p140_p9)  ;;  %v259_v22 = vld [vmem:[%s815_s2 + $0x48] sm:$0xff] (!%p140_p9)  ;;  %v260_v24 = vld [vmem:[%s815_s2 + $0x50] sm:$0xff] (!%p140_p9)  ;;  %s161_s9 = scalar_lea.vmem (!%p140_p9), [#allocation2], %s414_s7 }
  0x12   : > { %498 = vmatprep.subr.bf16.mxu1 (!%p140_p9), %v627_v3  ;;  %v508_v23 = vpack.c.bf16 (!%p140_p9), %v259_v22, %v258_v21  ;;  %v261_v25 = vld [vmem:[%s815_s2 + $0x58] sm:$0xff] (!%p140_p9)  ;;  %v262_v27 = vld [vmem:[%s815_s2 + $0x60] sm:$0xff] (!%p140_p9)  ;;  %v263_v28 = vld [vmem:[%s815_s2 + $0x68] sm:$0xff] (!%p140_p9)  ;;  %s351_s10 = sshll.u32 (!%p140_p9), %s161_s9, 4  ;;  %s772_s10 = int_to_ptr.vmem [resolvable:$true] %s351_s10 }
  0x13   : > { %v511_v26 = vpack.c.bf16 (!%p140_p9), %v261_v25, %v260_v24  ;;  %v514_v29 = vpack.c.bf16 (!%p140_p9), %v263_v28, %v262_v27  ;;  %v264_v30 = vld [vmem:[%s815_s2 + $0x70] sm:$0xff] (!%p140_p9)  ;;  %v265_v31 = vld [vmem:[%s815_s2 + $0x78] sm:$0xff] (!%p140_p9)  ;;  %s563_s24 = scalar_lea.vmem (!%p140_p9), %s772_s10, 128 }
  0x14   : > { %494 = vmatpush3.bf16.msra.mxu0 (!%p140_p9), %v493_v12  ;;  %v517_v32 = vpack.c.bf16 (!%p140_p9), %v265_v31, %v264_v30  ;;  %p564_p11 = scmp.ne.s32.totalorder (!%p140_p9), %s772_s10, %s563_s24 }
  0x15   : > { %s163_s19 = scalar_select %p162_p10, %s672_s16, 1  ;;  %500 = vmatpush3.bf16.msra.mxu1 %v499_v13 }
  0x16   : > { %501 = vmatprep.subr.bf16.mxu1 %v627_v3  ;;  %p565_p12 = pnand %p564_p11, %p689_p5  ;;  %s630_s16 = smov [#allocation2]  }
  0x17   : > { %s415_s20 = sshll.u32 %s163_s19, 3  ;;  %s770_s19 = scalar_lea.hbm %s816_s3, %s418_s8 }
  0x18   : > { %s165_s30 = scalar_lea.vmem %s813_s0, %s415_s20  ;;  %s338_s20 = scalar_lea.sflag [#allocation3], %s159_s6 }
  0x19   : > { %v166_v16 = vld [vmem:[%s165_s30] sm:$0xff]  ;;  %503 = vmatpush3.bf16.msra.mxu1 %v502_v17  ;;  %p566_p13 = pneg %p565_p12  ;;  %s567_s25 = sshll.u32 %s630_s16, 4  ;;  %s568_s25 = int_to_ptr.vmem [resolvable:$false] %s567_s25 }
  0x1a   : > { %452 = vmatmul.mubr.msk.f32.vlgmr.msra.gmra.mrb[0].mxu0 %vm171_vm1, %v166_v16  ;;  %504 = vmatprep.subr.bf16.mxu1 %v627_v3  ;;  %s569_s26 = scalar_lea.vmem %s568_s25, 256  ;;  %p570_p0 = scmp.lt.s32.totalorder %s772_s10, %s568_s25 }
  0x1b   : > { %p571_p1 = scmp.lt.s32.totalorder %s569_s26, %s563_s24 }
  0x1d   : > { %506 = vmatpush3.bf16.msra.mxu1 %v505_v20  ;;  %p572_p2 = por %p571_p1, %p570_p0 }
  0x1e   : > { %507 = vmatprep.subr.bf16.mxu1 %v627_v3 }
  0x1f   : > { %p573_p3 = pnand %p572_p2, %p566_p13 }
  0x21   : > { %509 = vmatpush3.bf16.msra.mxu1 %v508_v23 }
  0x22   : > { %510 = vmatprep.subr.bf16.mxu1 %v627_v3 }
  0x25   : > { %512 = vmatpush3.bf16.msra.mxu1 %v511_v26 }
  0x26   : > { %513 = vmatprep.subr.bf16.mxu1 %v627_v3 }
  0x29   : > { %515 = vmatpush3.bf16.msra.mxu1 %v514_v29 }
  0x2a   : > { %516 = vmatprep.subr.bf16.mxu1 %v627_v3 }
  0x2d   : > { %518 = vmatpush3.bf16.msra.mxu1 %v517_v32 }
  0xed   : > { %v241_v33 = vpop.f32.mrb[0].mxu0 }
  0xee   : > { %v246_v34 = vmul.f32 0.70710677, %v241_v33  ;;  %v453_v35 = vpop.f32.mrb[1].mxu0  ;;  %v245_v37 = vmul.f32 0.5, %v241_v33 }
  0xf0   : > { %561 = verf.f32 %v246_v34 }
  0xfa   : > { %v562_v36 = vpop.eup %561 }
  0xfb   : > { %v248_v38 = vadd.f32 1.0, %v562_v36 }
  0xfd   : > { %v249_v39 = vmul.f32 %v248_v38, %v245_v37 }
  0xff   : > { %487 = vmatmul.mubr.f32.vlgmr.msra.gmra.mrb[0].mxu1 %v249_v39 }
 0x1d2   : > { %v332_v40 = vpop.f32.mrb[0].mxu1 }
 0x1d3   : > { %336 = vst.msk [vmem:[%s161_s9] sm:$0xff] %vm171_vm1, %v332_v40  ;;  %v488_v41 = vpop.f32.mrb[1].mxu1 }
 0x1d4   : > { %576 = shalt.err (!%p573_p3)
}
 0x1d5   : > { %s577_s27 = scalar_lea.hbm %s770_s19, 128  ;;  %s581_s30 = scalar_lea.hbm %s816_s3, 256 }
 0x1d6   : > { %p578_p4 = scmp.ne.s32.totalorder %s770_s19, %s577_s27  ;;  %p582_p9 = scmp.lt.u32.totalorder %s770_s19, %s816_s3 }
 0x1d7   : > { %p583_p10 = scmp.lt.u32.totalorder %s581_s30, %s577_s27  ;;  %p585_p12 = scmp.lt.u32.totalorder %s577_s27, %s770_s19 }
 0x1d8   : > { %p579_p7 = pnand %p578_p4, %p689_p5 }
 0x1d9   : > { %p584_p11 = por %p583_p10, %p582_p9 }
 0x1da   : > { %p580_p8 = pneg %p579_p7 }
 0x1db   : > { %p586_p13 = por %p585_p12, %p584_p11 }
 0x1dd   : > { %p587_p0 = pnand %p586_p13, %p580_p8 }
 0x1df   : > { %590 = shalt.err (!%p587_p0)
}
 0x1e0   : > { %519 = dma.vmem_to_hbm [thread:$0]  (%p689_p5), %s772_s10, 128, %s770_s19, %s338_s20  }
 0x1e1 PF: > { %p525_p1 = scmp.ge.s32.totalorder %s625_s15, 2  ;;  %s363_s6 = sand.u32 1, %s613_s12  }
 0x1e2   : > { %s364_s7 = scalar_lea.sflag [#allocation3], %s363_s6 }
 0x1e3   : > { %p522_p2 = pnand %p525_p1, %p693_p6 }
 0x1e5   : > { %608 = dma.done.wait (!%p522_p2), %s364_s7, 128  }
 0x1e6   : > { %610 = vsyncadd (!%p522_p2), %s364_s7, 4294967168  ;;  %p13_p3 = scmp.ge.s32.totalorder %s676_s18, 4   ;;  %s819_s12 = smov %s617_s13 }
 0x1e7   : > { %s820_s13 = smov %s621_s14  ;;  %s821_s14 = smov %s687_s21 }
 0x1e8   : > { %s822_s15 = smov %s676_s18  ;;  %15 = sbr.rel (!%p13_p3) target bundleno = 3 (0x3), region = 67 }
 0x1ef   :  { %369 = vsyncpa [#allocation3], 1 }
 0x1f0   :  { %371 = vsyncpa [#allocation3 + $0x1], 1 }

</bundles_post_ra>
